<compile_context>
chip_gen: v7x
topology: tpu7x:2x2x1
jax: 0.10.0
libtpu: 0.0.40
codegen_flags: <defaults>
</compile_context>

<pallas_src>
import jax
import jax.numpy as jnp
from jax.experimental import pallas as pl
from jax.experimental.pallas import tpu as pltpu


def _round_up(x, m):
    return ((x + m - 1) // m) * m


def _largest_tile_divisor(n, target, lane=128):
    """Largest multiple of `lane` that divides n and is <= target (None if none)."""
    t = (min(target, n) // lane) * lane
    while t >= lane:
        if n % t == 0:
            return t
        t -= lane
    return None


def _device_vmem_bytes():
    """Physical VMEM capacity of the local TPU; conservative fallback if unknown."""
    try:
        info = pltpu.get_tpu_info()
        for attr in ("vmem_capacity_bytes", "vmem_bytes", "vmem_size_bytes"):
            v = getattr(info, attr, None)
            if v:
                return int(v)
    except Exception:
        pass
    return 64 * 1024 * 1024  # v7x per-TC size; safe lower bound for v5e/v6e too


# --------------------------------------------------------------------------- #
# Kernel bodies
# --------------------------------------------------------------------------- #

def _ffn_kernel_resident(x_ref, w1_ref, b1_ref, w2_ref, b2_ref, o_ref):
    # Weights fully resident in VMEM (single H step): no accumulator needed.
    h = jnp.dot(x_ref[...], w1_ref[...], preferred_element_type=jnp.float32)
    h = jnp.maximum(h + b1_ref[...], 0.0)
    y = jnp.dot(h.astype(w2_ref.dtype), w2_ref[...],
                preferred_element_type=jnp.float32)
    # TODO(synk): dropout is eval-mode identity; training-mode dropout would use
    # pltpu.prng_seed + pltpu.prng_random_bits + compare/select here.
    o_ref[...] = (y + b2_ref[...]).astype(o_ref.dtype)


def _ffn_kernel_htiled_scratch(x_ref, w1_ref, b1_ref, w2_ref, b2_ref, o_ref,
                               acc_ref):
    # H tiled on grid axis 1; f32 VMEM scratch accumulator (non-f32 output dtype).
    h_idx = pl.program_id(1)

    @pl.when(h_idx == 0)
    def _():
        acc_ref[...] = jnp.zeros_like(acc_ref)

    h = jnp.dot(x_ref[...], w1_ref[...], preferred_element_type=jnp.float32)
    h = jnp.maximum(h + b1_ref[...], 0.0)
    acc_ref[...] += jnp.dot(h.astype(w2_ref.dtype), w2_ref[...],
                            preferred_element_type=jnp.float32)

    @pl.when(h_idx == pl.num_programs(1) - 1)
    def _():
        o_ref[...] = (acc_ref[...] + b2_ref[...]).astype(o_ref.dtype)


def _ffn_kernel_htiled_inplace(x_ref, w1_ref, b1_ref, w2_ref, b2_ref, o_ref):
    # H tiled; f32 output block is VMEM-resident across the H axis, so accumulate
    # directly into it (saves tile_m*E*4 bytes of scratch).
    h_idx = pl.program_id(1)

    @pl.when(h_idx == 0)
    def _():
        o_ref[...] = jnp.broadcast_to(b2_ref[...], o_ref.shape).astype(o_ref.dtype)

    h = jnp.dot(x_ref[...], w1_ref[...], preferred_element_type=jnp.float32)
    h = jnp.maximum(h + b1_ref[...], 0.0)
    o_ref[...] += jnp.dot(h.astype(w2_ref.dtype), w2_ref[...],
                          preferred_element_type=jnp.float32)


# --------------------------------------------------------------------------- #
# Wrapper
# --------------------------------------------------------------------------- #

def feed_forward(x, w1, b1, w2, b2, *, tile_m=512, tile_h=None,
                 compute_dtype=jnp.bfloat16):
    """x: (B, T, E) -> (B, T, E).  Weights stored as (in, out): kernel does x @ W + b."""
    B, T, E = x.shape
    H = w1.shape[1]
    M = B * T
    out_dtype = x.dtype
    out_is_f32 = jnp.dtype(out_dtype) == jnp.dtype(jnp.float32)

    itemsize = jnp.dtype(compute_dtype).itemsize
    out_itemsize = jnp.dtype(out_dtype).itemsize
    pack = 16 if itemsize == 2 else 8  # sublane packing granularity

    vmem_cap = _device_vmem_bytes()
    headroom = 4 * 1024 * 1024
    budget = vmem_cap - headroom

    # --- row tiling -------------------------------------------------------- #
    tile_m = max(pack, min(tile_m, _round_up(M, pack)))
    tile_m = _round_up(tile_m, pack)
    M_pad = _round_up(M, tile_m)
    m_tiles = M_pad // tile_m

    # --- VMEM footprint model (blocks are double-buffered by BlockSpec) ----- #
    def footprint(th, h_tiled):
        fp = 2 * tile_m * E * itemsize                 # x blocks
        fp += 2 * 2 * E * th * itemsize                # W1 + W2 blocks
        fp += 2 * 2 * (th + E) * 4                     # biases (f32)
        fp += 2 * tile_m * E * out_itemsize            # output blocks
        fp += tile_m * th * (4 + itemsize)             # f32 hidden + bf16 recast
        if h_tiled and not out_is_f32:
            fp += tile_m * E * 4                       # f32 accumulator scratch
        return fp

    # --- hidden-dim tiling: keep weights resident when they fit ------------- #
    if tile_h is None:
        if footprint(H, False) <= budget:
            tile_h = H                                  # weights resident, DMA'd once
        else:
            target = 1024 if vmem_cap <= 64 * 1024 * 1024 else 2048
            tile_h = _largest_tile_divisor(H, target)
            if tile_h is None:                          # no friendly divisor: pad H
                tile_h = min(_round_up(target, 128), _round_up(H, 128))

    resident = tile_h >= H
    if resident:
        tile_h = H
        H_pad = H
    else:
        tile_h = _round_up(tile_h, 128)
        H_pad = _round_up(H, tile_h)

    # --- prepare operands ---------------------------------------------------- #
    x2d = x.reshape(M, E).astype(compute_dtype)
    if M_pad != M:
        x2d = jnp.pad(x2d, ((0, M_pad - M), (0, 0)))

    w1c = w1.astype(compute_dtype)
    w2c = w2.astype(compute_dtype)
    b1f = b1.reshape(1, H).astype(jnp.float32)
    b2f = b2.reshape(1, E).astype(jnp.float32)
    if H_pad != H:
        # Zero-padded hidden columns: ReLU(0 + 0) = 0 and zero W2 rows -> no effect.
        w1c = jnp.pad(w1c, ((0, 0), (0, H_pad - H)))
        b1f = jnp.pad(b1f, ((0, 0), (0, H_pad - H)))
        w2c = jnp.pad(w2c, ((0, H_pad - H), (0, 0)))

    # --- grid / specs / kernel selection ------------------------------------ #
    if resident:
        grid = (m_tiles,)
        in_specs = [
            pl.BlockSpec((tile_m, E), lambda i: (i, 0)),   # x rows
            pl.BlockSpec((E, H_pad), lambda i: (0, 0)),    # W1 (resident)
            pl.BlockSpec((1, H_pad), lambda i: (0, 0)),    # b1 (resident)
            pl.BlockSpec((H_pad, E), lambda i: (0, 0)),    # W2 (resident)
            pl.BlockSpec((1, E), lambda i: (0, 0)),        # b2 (resident)
        ]
        out_specs = pl.BlockSpec((tile_m, E), lambda i: (i, 0))
        scratch = []
        kernel = _ffn_kernel_resident
        dims = ("parallel",)
        weight_streams = 1
    else:
        grid = (m_tiles, H_pad // tile_h)
        in_specs = [
            pl.BlockSpec((tile_m, E), lambda i, h: (i, 0)),   # x rows (reused over H)
            pl.BlockSpec((E, tile_h), lambda i, h: (0, h)),   # W1 H-chunk
            pl.BlockSpec((1, tile_h), lambda i, h: (0, h)),   # b1 H-chunk
            pl.BlockSpec((tile_h, E), lambda i, h: (h, 0)),   # W2 H-chunk
            pl.BlockSpec((1, E), lambda i, h: (0, 0)),        # b2 (constant)
        ]
        out_specs = pl.BlockSpec((tile_m, E), lambda i, h: (i, 0))
        dims = ("parallel", "arbitrary")
        weight_streams = m_tiles
        if out_is_f32:
            scratch = []
            kernel = _ffn_kernel_htiled_inplace
        else:
            scratch = [pltpu.VMEM((tile_m, E), jnp.float32)]
            kernel = _ffn_kernel_htiled_scratch

    # --- cost estimate matching the actual schedule ------------------------- #
    cost = pl.CostEstimate(
        flops=4 * M_pad * E * H_pad,
        transcendentals=0,
        bytes_accessed=int(M_pad * E * itemsize                     # x in
                           + M_pad * E * out_itemsize               # y out
                           + weight_streams * 2 * E * H_pad * itemsize   # W1+W2 streams
                           + weight_streams * H_pad * 4 + E * 4),   # biases
    )

    # --- device-aware VMEM limit (v5e default scoped limit is 16 MiB) ------- #
    vmem_est = footprint(tile_h, not resident)
    compiler_kwargs = dict(dimension_semantics=dims)
    if vmem_est > 16 * 1024 * 1024:
        limit = max(int(1.25 * vmem_est), 32 * 1024 * 1024)
        compiler_kwargs["vmem_limit_bytes"] = int(min(limit, budget))

    out = pl.pallas_call(
        kernel,
        out_shape=jax.ShapeDtypeStruct((M_pad, E), out_dtype),
        grid_spec=pltpu.PrefetchScalarGridSpec(
            num_scalar_prefetch=0,
            grid=grid,
            in_specs=in_specs,
            out_specs=out_specs,
            scratch_shapes=scratch,
        ),
        compiler_params=pltpu.CompilerParams(**compiler_kwargs),
        cost_estimate=cost,
    )(x2d, w1c, b1f, w2c, b2f)

    if M_pad != M:
        out = out[:M]
    return out.reshape(B, T, E)


# --------------------------------------------------------------------------- #
# Init + reference
# --------------------------------------------------------------------------- #

def init_params(key, n_embedding):
    """Deterministic PyTorch-style Linear init: U(-1/sqrt(fan_in), 1/sqrt(fan_in))."""
    hidden = 4 * n_embedding
    k1, k2, k3, k4 = jax.random.split(key, 4)
    bound1 = 1.0 / jnp.sqrt(n_embedding)
    bound2 = 1.0 / jnp.sqrt(hidden)
    # stored as (in, out): equivalent to PyTorch weight (out, in) transposed
    w1 = jax.random.uniform(k1, (n_embedding, hidden), jnp.float32, -bound1, bound1)
    b1 = jax.random.uniform(k2, (hidden,), jnp.float32, -bound1, bound1)
    w2 = jax.random.uniform(k3, (hidden, n_embedding), jnp.float32, -bound2, bound2)
    b2 = jax.random.uniform(k4, (n_embedding,), jnp.float32, -bound2, bound2)
    return w1, b1, w2, b2


def feed_forward_ref(x, w1, b1, w2, b2):
    h = jnp.maximum(x @ w1 + b1, 0.0)
    return h @ w2 + b2


if __name__ == "__main__":
    key = jax.random.PRNGKey(0)
    B, T, E = 2, 8, 32          # batch=2, seq=8, n_embedding=32 -> hidden=128
    kx, kp = jax.random.split(key)
    x = jax.random.normal(kx, (B, T, E), jnp.float32)
    w1, b1, w2, b2 = init_params(kp, E)

    y = feed_forward(x, w1, b1, w2, b2)
    y = jax.block_until_ready(y)

    y_ref = feed_forward_ref(x, w1, b1, w2, b2)
    assert y.shape == (B, T, E)
    # bf16 matmuls with f32 accumulation: allow ~1e-2-scale error vs f32 reference.
    assert jnp.allclose(y, y_ref, atol=5e-2, rtol=5e-2), (
        float(jnp.max(jnp.abs(y - y_ref))))

    print("KERNEL_OK")
</pallas_src>

<mosaic_0001>
module attributes {stable_mosaic.version = 11 : i64} {
  func.func @_ffn_kernel_resident(%arg0: i32, %arg1: memref<16x32xbf16, #tpu.memory_space<vmem>>, %arg2: memref<32x128xbf16, #tpu.memory_space<vmem>>, %arg3: memref<1x128xf32, #tpu.memory_space<vmem>>, %arg4: memref<128x32xbf16, #tpu.memory_space<vmem>>, %arg5: memref<1x32xf32, #tpu.memory_space<vmem>>, %arg6: memref<16x32xf32, #tpu.memory_space<vmem>>) attributes {dimension_semantics = [#tpu.dimension_semantics<parallel>], iteration_bounds = array<i64: 1>, scalar_prefetch = 0 : i64, scratch_operands = 0 : i64, tpu.core_type = #tpu.core_type<tc>, window_params = [{transform_indices = @transform_0, window_bounds = array<i64: 16, 32>}, {pipeline_mode = #tpu.pipeline_mode<synchronous>, transform_indices = @transform_1, window_bounds = array<i64: 32, 128>}, {pipeline_mode = #tpu.pipeline_mode<synchronous>, transform_indices = @transform_2, window_bounds = array<i64: 1, 128>}, {pipeline_mode = #tpu.pipeline_mode<synchronous>, transform_indices = @transform_3, window_bounds = array<i64: 128, 32>}, {pipeline_mode = #tpu.pipeline_mode<synchronous>, transform_indices = @transform_4, window_bounds = array<i64: 1, 32>}, {transform_indices = @transform_5, window_bounds = array<i64: 16, 32>}]} {
    %c0 = arith.constant 0 : index
    %c0_0 = arith.constant 0 : index
    %0 = vector.load %arg1[%c0, %c0_0] : memref<16x32xbf16, #tpu.memory_space<vmem>>, vector<16x32xbf16>
    %c0_1 = arith.constant 0 : index
    %c0_2 = arith.constant 0 : index
    %1 = vector.load %arg2[%c0_1, %c0_2] : memref<32x128xbf16, #tpu.memory_space<vmem>>, vector<32x128xbf16>
    %cst = arith.constant dense<0.000000e+00> : vector<16x128xf32>
    %2 = tpu.matmul %0, %1, %cst {dimension_numbers = #tpu.dot_dimension_numbers<[1], [0], [0], [1], [0, 0, 1, 1], [], []>} : vector<16x32xbf16>, vector<32x128xbf16>, vector<16x128xf32> -> vector<16x128xf32>
    %c0_3 = arith.constant 0 : index
    %c0_4 = arith.constant 0 : index
    %3 = vector.load %arg3[%c0_3, %c0_4] : memref<1x128xf32, #tpu.memory_space<vmem>>, vector<1x128xf32>
    %4 = vector.broadcast %3 : vector<1x128xf32> to vector<16x128xf32>
    %5 = arith.addf %2, %4 : vector<16x128xf32>
    %cst_5 = arith.constant 0.000000e+00 : f32
    %6 = vector.broadcast %cst_5 : f32 to vector<16x128xf32>
    %7 = arith.maximumf %5, %6 : vector<16x128xf32>
    %8 = arith.truncf %7 : vector<16x128xf32> to vector<16x128xbf16>
    %c0_6 = arith.constant 0 : index
    %c0_7 = arith.constant 0 : index
    %9 = vector.load %arg4[%c0_6, %c0_7] : memref<128x32xbf16, #tpu.memory_space<vmem>>, vector<128x32xbf16>
    %cst_8 = arith.constant dense<0.000000e+00> : vector<16x32xf32>
    %10 = tpu.matmul %8, %9, %cst_8 {dimension_numbers = #tpu.dot_dimension_numbers<[1], [0], [0], [1], [0, 0, 1, 1], [], []>} : vector<16x128xbf16>, vector<128x32xbf16>, vector<16x32xf32> -> vector<16x32xf32>
    %c0_9 = arith.constant 0 : index
    %c0_10 = arith.constant 0 : index
    %11 = vector.load %arg5[%c0_9, %c0_10] : memref<1x32xf32, #tpu.memory_space<vmem>>, vector<1x32xf32>
    %12 = vector.broadcast %11 : vector<1x32xf32> to vector<16x32xf32>
    %13 = arith.addf %10, %12 : vector<16x32xf32>
    %c0_11 = arith.constant 0 : index
    %c0_12 = arith.constant 0 : index
    %14 = vector.load %arg6[%c0_11, %c0_12] : memref<16x32xf32, #tpu.memory_space<vmem>>, vector<16x32xf32>
    tpu.vector_store %arg6[%c0_11, %c0_12], %13 {strides = array<i32>} : memref<16x32xf32, #tpu.memory_space<vmem>>, vector<16x32xf32>,
    return
  }
  func.func @transform_0(%arg0: i32) -> (i32, i32) {
    %c0_i32 = arith.constant 0 : i32
    %c0_i32_0 = arith.constant 0 : i32
    return %arg0, %c0_i32 : i32, i32
  }
  func.func @transform_1(%arg0: i32) -> (i32, i32) {
    %c0_i32 = arith.constant 0 : i32
    %c0_i32_0 = arith.constant 0 : i32
    %c0_i32_1 = arith.constant 0 : i32
    return %c0_i32, %c0_i32_0 : i32, i32
  }
  func.func @transform_2(%arg0: i32) -> (i32, i32) {
    %c0_i32 = arith.constant 0 : i32
    %c0_i32_0 = arith.constant 0 : i32
    %c0_i32_1 = arith.constant 0 : i32
    return %c0_i32, %c0_i32_0 : i32, i32
  }
  func.func @transform_3(%arg0: i32) -> (i32, i32) {
    %c0_i32 = arith.constant 0 : i32
    %c0_i32_0 = arith.constant 0 : i32
    %c0_i32_1 = arith.constant 0 : i32
    return %c0_i32, %c0_i32_0 : i32, i32
  }
  func.func @transform_4(%arg0: i32) -> (i32, i32) {
    %c0_i32 = arith.constant 0 : i32
    %c0_i32_0 = arith.constant 0 : i32
    %c0_i32_1 = arith.constant 0 : i32
    return %c0_i32, %c0_i32_0 : i32, i32
  }
  func.func @transform_5(%arg0: i32) -> (i32, i32) {
    %c0_i32 = arith.constant 0 : i32
    %c0_i32_0 = arith.constant 0 : i32
    return %arg0, %c0_i32 : i32, i32
  }
}

</mosaic_0001>

<bundles_post_ra>
// kernel: tpu_custom_call.1
= control target key start
LH: loop header
LB: loop body
LE: loop exit
PB: predicated region body
PF: predicated region fallthrough
CT: control target
= control target key end

     0   :  { %v324_v1 = vmov 0.0   ;;  %vm325_vm0 = vmmov 0   ;;  %vm52_vm1 = vcmask 261120   ;;  %s413_s0 = inlined_call_operand.vmem [shape: bf16[16,32], index: 0, kind: input, shape index: {}]   ;;  %s414_s1 = inlined_call_operand.vmem [shape: bf16[32,128], index: 1, kind: input, shape index: {}]   ;;  %s415_s2 = inlined_call_operand.vmem [shape: f32[1,128], index: 2, kind: input, shape index: {}]   ;;  %s416_s3 = inlined_call_operand.vmem [shape: bf16[128,32], index: 3, kind: input, shape index: {}]   ;;  %s417_s4 = inlined_call_operand.vmem [shape: f32[1,32], index: 4, kind: input, shape index: {}]   ;;  %s418_s5 = inlined_call_operand.hbm [shape: f32[16,32], index: 5, kind: output, shape index: {}]  }
   0x1   :  { %v289_v0 = vld [vmem:[%s414_s1] sm:$0xff]   ;;  %256 = vmatprep.subr.bf16.mxu0 %v324_v1  ;;  %264 = vmatprep.subr.bf16.mxu1 %v324_v1  ;;  %v290_v2 = vld [vmem:[%s414_s1 + $0x8] sm:$0xff]   ;;  %v294_v6 = vld [vmem:[%s416_s3 + $0x10] sm:$0xff]  }
   0x2   :  { %257 = vmatpush3.bf16.msra.mxu0 %v289_v0  ;;  %260 = vmatprep.mubr.msk.bf16.mxu0 %vm325_vm0, %v324_v1  ;;  %v292_v3 = vld [vmem:[%s416_s3] sm:$0xff]   ;;  %v293_v5 = vld [vmem:[%s416_s3 + $0x8] sm:$0xff]  }
   0x3   :  { %258 = vmatprep.subr.bf16.mxu0 %v324_v1  ;;  %280 = vmatprep.mubr.msk.bf16.mxu1 %vm325_vm0, %v324_v1  ;;  %v291_v4 = vld [vmem:[%s413_s0] sm:$0xff]  }
   0x4   :  { %265 = vmatpush3.bf16.msra.mxu1 %v292_v3 }
   0x5   :  { %266 = vmatprep.subr.bf16.mxu1 %v324_v1 }
   0x6   :  { %259 = vmatpush3.bf16.msra.mxu0 %v290_v2 }
   0x8   :  { %267 = vmatpush3.bf16.msra.mxu1 %v293_v5 }
   0x9   :  { %261 = vmatmul.mubr.msk.bf16.vlgmr.msra.gmra.mrb[0].mxu0 %vm52_vm1, %v291_v4  ;;  %268 = vmatprep.subr.bf16.mxu1 %v324_v1 }
   0xa   :  { %10 = vsyncpa [#allocation3], 0  ;;  %v295_v7 = vld [vmem:[%s416_s3 + $0x18] sm:$0xff]   ;;  %v296_v8 = vld [vmem:[%s416_s3 + $0x20] sm:$0xff]  }
   0xb   :  { %v297_v9 = vld [vmem:[%s416_s3 + $0x28] sm:$0xff]   ;;  %v298_v10 = vld [vmem:[%s416_s3 + $0x30] sm:$0xff]   ;;  %v299_v11 = vld [vmem:[%s416_s3 + $0x38] sm:$0xff]   ;;  %s326_s3 = smov [#allocation2]  }
   0xc   :  { %269 = vmatpush3.bf16.msra.mxu1 %v294_v6  ;;  %v230_v12 = vld [vmem:[%s415_s2] ss:$0 sm:$0xff]  ;;  %s219_s17 = sshll.u32 %s326_s3, 4  ;;  %s220_s17 = int_to_ptr.vmem [resolvable:$true] %s219_s17 }
   0xd   :  { %270 = vmatprep.subr.bf16.mxu1 %v324_v1  ;;  %v235_v22 = vld [vmem:[%s417_s4] ss:$0 sm:$0xff]  ;;  %s300_s2 = scalar_lea.vmem %s220_s17, 256  ;;  %p305_p1 = scmp.lt.s32.totalorder %s220_s17, %s220_s17 }
   0xe   :  { %p301_p0 = scmp.ne.s32.totalorder %s220_s17, %s300_s2  ;;  %p306_p2 = scmp.lt.s32.totalorder %s300_s2, %s300_s2 }
  0x10   :  { %271 = vmatpush3.bf16.msra.mxu1 %v295_v7  ;;  %p307_p3 = por %p306_p2, %p305_p1 }
  0x11   :  { %272 = vmatprep.subr.bf16.mxu1 %v324_v1 }
  0x12   :  { %p308_p4 = pnand %p307_p3, %p301_p0 }
  0x14   :  { %273 = vmatpush3.bf16.msra.mxu1 %v296_v8 }
  0x15   :  { %274 = vmatprep.subr.bf16.mxu1 %v324_v1 }
  0x18   :  { %275 = vmatpush3.bf16.msra.mxu1 %v297_v9 }
  0x19   :  { %276 = vmatprep.subr.bf16.mxu1 %v324_v1 }
  0x1c   :  { %277 = vmatpush3.bf16.msra.mxu1 %v298_v10 }
  0x1d   :  { %278 = vmatprep.subr.bf16.mxu1 %v324_v1 }
  0x20   :  { %279 = vmatpush3.bf16.msra.mxu1 %v299_v11 }
  0xdc   :  { %v90_v13 = vpop.f32.mrb[0].mxu0 }
  0xdd   :  { %v91_v14 = vadd.f32 %v230_v12, %v90_v13  ;;  %v262_v15 = vpop.f32.mrb[1].mxu0 }
  0xde   :  { %v93_v16 = vpop.f32.mrb[2].mxu0 }
  0xdf   :  { %v94_v17 = vadd.f32 %v230_v12, %v93_v16  ;;  %v263_v18 = vpop.f32.mrb[3].mxu0  ;;  %v97_v19 = vmax.f32 %v91_v14, 0.0 }
  0xe1   :  { %v98_v20 = vmax.f32 %v94_v17, 0.0 }
  0xe3   :  { %v99_v21 = vpack.c.bf16 %v98_v20, %v97_v19 }
  0xe5   :  { %281 = vmatmul.mubr.bf16.vlgmr.msra.gmra.mrb[0].mxu1 %v99_v21 }
 0x1b8   :  { %v205_v23 = vpop.f32.mrb[0].mxu1 }
 0x1b9   :  { %v206_v24 = vadd.f32 %v235_v22, %v205_v23  ;;  %v282_v25 = vpop.f32.mrb[1].mxu1 }
 0x1ba   :  { %v208_v26 = vpop.f32.mrb[2].mxu1 }
 0x1bb   :  { %212 = vst.msk [vmem:[#allocation2] sm:$0xff] %vm52_vm1, %v206_v24  ;;  %v209_v27 = vadd.f32 %v235_v22, %v208_v26  ;;  %v283_v28 = vpop.f32.mrb[3].mxu1 }
 0x1bd   :  { %213 = vst.msk [vmem:[#allocation2 + $0x8] sm:$0xff] %vm52_vm1, %v209_v27 }
 0x1be   :  { %311 = shalt.err (!%p308_p4)
}
 0x1bf   :  { %s312_s19 = scalar_lea.hbm %s418_s5, 256 }
 0x1c0   :  { %p313_p5 = scmp.ne.s32.totalorder %s418_s5, %s312_s19  ;;  %p316_p6 = scmp.lt.u32.totalorder %s312_s19, %s418_s5 }
 0x1c2   :  { %p318_p7 = pnand %p316_p6, %p313_p5 }
 0x1c4   :  { %321 = shalt.err (!%p318_p7)
}
 0x1c5   :  { %s327_s24 = smov 128   ;;  %s328_s25 = smov 8  }
 0x1c6   :  { %225 = dma.vmem_to_hbm [thread:$0]  %s220_s17, 256, %s418_s5, [#allocation3], %s327_s24, %s327_s24, %s328_s25  }
 0x1c7   :  { %322 = dma.done.wait [#allocation3], 256  }
 0x1c8   :  { %323 = vsyncadd [#allocation3], 4294967040 }
 0x1c9   :  { %229 = vsyncpa [#allocation3], 1 }

</bundles_post_ra>
